<compile_context>
chip_gen: v7x
topology: tpu7x:2x2x1
jax: 0.10.0
libtpu: 0.0.40
codegen_flags: <defaults>
</compile_context>

<pallas_src>
import jax
import jax.numpy as jnp
from jax.experimental import pallas as pl
from jax.experimental.pallas import tpu as pltpu


def _stats_kernel(logits_ref, tgt_ref, out_ref, acc_ref):
    """Accumulates per-class statistics over spatial tiles of one batch element.

    acc/out columns (lane index):
      0: sum_{pixels of class c} -log p_c   (CE numerator per class)
      1: pixel count per class               (== dice target sum for hard labels)
      2: sum p_c * onehot_c                  (dice intersection)
      3: sum p_c over valid pixels           (dice pred sum)
    """
    i = pl.program_id(1)

    @pl.when(i == 0)
    def _init():
        acc_ref[...] = jnp.zeros_like(acc_ref)

    logits = logits_ref[0].astype(jnp.float32)        # (C, TN)
    tgt = tgt_ref[0]                                  # (1, TN) int32 (-1 = pad)

    # numerically stable softmax / log-softmax over the class (sublane) axis
    m = jnp.max(logits, axis=0, keepdims=True)        # (1, TN)
    ex = jnp.exp(logits - m)
    denom = jnp.sum(ex, axis=0, keepdims=True)
    p = ex * pl.reciprocal(denom, approx=True)        # (C, TN)  (EUP, not VALU)
    logp = (logits - m) - jnp.log(denom)              # (C, TN)

    cls = jax.lax.broadcasted_iota(jnp.int32, logits.shape, 0)
    onehot = (cls == tgt).astype(jnp.float32)         # (C, TN); pad rows all-zero
    valid = (tgt >= 0).astype(jnp.float32)            # (1, TN) pad mask
    p = p * valid                                     # exclude pad pixels from psum

    celoss_c = jnp.sum(-logp * onehot, axis=1, keepdims=True)  # (C, 1)
    count_c = jnp.sum(onehot, axis=1, keepdims=True)           # (C, 1)
    inter_c = jnp.sum(p * onehot, axis=1, keepdims=True)       # (C, 1)
    psum_c = jnp.sum(p, axis=1, keepdims=True)                 # (C, 1)

    # place the four (C,1) stats into fixed lanes of the lane-dense accumulator
    lane = jax.lax.broadcasted_iota(jnp.int32, acc_ref.shape, 1)   # (C, 128)
    zero = jnp.zeros(acc_ref.shape, jnp.float32)
    acc_ref[...] += (jnp.where(lane == 0, celoss_c, zero)
                     + jnp.where(lane == 1, count_c, zero)
                     + jnp.where(lane == 2, inter_c, zero)
                     + jnp.where(lane == 3, psum_c, zero))

    @pl.when(i == pl.num_programs(1) - 1)
    def _flush():
        out_ref[0] = acc_ref[...]                     # single lane-dense store


def _choose_tile(hw, max_tn=8192):
    """Lane tile TN (multiple of 128, ~<= max_tn) and padded spatial extent."""
    num_tiles = max(1, (hw + max_tn - 1) // max_tn)
    tn = (hw + num_tiles - 1) // num_tiles
    tn = ((tn + 127) // 128) * 128
    return tn, tn * num_tiles


def _scale_stats(logits_ncs, target, max_tn=8192):
    """Run the Pallas reduction kernel for one deep-supervision scale.

    logits_ncs: (B, C, *spatial) in the network's native dtype (f32/bf16).
    target:     (B, 1, *spatial) integer class labels.
    Returns (C, 4) float32 stats: [ce_sum, count, intersection, pred_sum].
    """
    shp = logits_ncs.shape
    B, C = shp[0], shp[1]
    hw = 1
    for d in shp[2:]:
        hw *= d

    lg = logits_ncs.reshape(B, C, hw)             # free reshape for NCHW layout
    tg = target.reshape(B, 1, hw).astype(jnp.int32)

    TN, hw_pad = _choose_tile(hw, max_tn)
    if hw_pad != hw:
        pad = hw_pad - hw
        lg = jnp.pad(lg, ((0, 0), (0, 0), (0, pad)))
        tg = jnp.pad(tg, ((0, 0), (0, 0), (0, pad)), constant_values=-1)

    grid = (B, hw_pad // TN)

    out = pl.pallas_call(
        _stats_kernel,
        out_shape=jax.ShapeDtypeStruct((B, C, 128), jnp.float32),
        grid_spec=pltpu.PrefetchScalarGridSpec(
            num_scalar_prefetch=0,
            grid=grid,
            in_specs=[pl.BlockSpec((1, C, TN), lambda b, i: (b, 0, i)),
                      pl.BlockSpec((1, 1, TN), lambda b, i: (b, 0, i))],
            out_specs=pl.BlockSpec((1, C, 128), lambda b, i: (b, 0, 0)),
            scratch_shapes=[pltpu.VMEM((C, 128), jnp.float32)]),
        compiler_params=pltpu.CompilerParams(
            dimension_semantics=("parallel", "arbitrary")),
    )(lg, tg)

    # per-batch partials summed here (keeps the batch grid axis 'parallel' so
    # v7x's second TensorCore gets work); only first 4 lanes carry data.
    stats = jnp.sum(out, axis=0)[:, :4]           # (C, 4)
    return stats


def _loss_from_stats(stats, w_ce, w_dice, eps=1e-5):
    """0.5 * weighted CE + 0.5 * weighted soft-Dice, from per-class stats."""
    celoss_c = stats[:, 0]
    count_c = stats[:, 1]
    inter_c = stats[:, 2]
    psum_c = stats[:, 3]
    tsum_c = count_c                      # hard one-hot labels: target sum == count
    ce = jnp.sum(w_ce * celoss_c) / jnp.maximum(jnp.sum(w_ce * count_c), 1e-8)
    dc = (2.0 * inter_c + eps) / (psum_c + tsum_c + eps)
    dice = 1.0 - jnp.sum(w_dice * dc) / jnp.maximum(jnp.sum(w_dice), 1e-8)
    return 0.5 * ce + 0.5 * dice


class MultipleOutputLoss2:
    """JAX/Pallas port of nnunet deep_supervision.MultipleOutputLoss2.forward."""

    def __init__(self, weight_factors=None):
        self.weight_factors = weight_factors

    def __call__(self, x, y, w=None, w_1=None):
        assert isinstance(x, (tuple, list)), 'x must be either tuple or list'
        assert isinstance(y, (tuple, list)), 'y must be either tuple or list'
        if self.weight_factors is None:
            weights = [1] * len(x)
        else:
            weights = self.weight_factors

        w, w_1, e, m = w
        num_classes = x[0].shape[1]
        normal_weight = jnp.ones_like(w) / num_classes
        # TODO(synk): e/m and weight_factors are treated as Python scalars (as in
        # the reference module); make them jnp.where-based if they become traced.
        if e < m:
            w_nnu = 1.0 - e / m
            w_ada = 1.0 - w_nnu
        else:
            w_nnu = 0.0
            w_ada = 1.0

        stats0 = _scale_stats(x[0], y[0])
        l = weights[0] * (
            w_nnu * _loss_from_stats(stats0, normal_weight[0], normal_weight[0])
            + w_ada * _loss_from_stats(stats0, w[0], w_1[0]))
        for i in range(1, len(x)):
            if weights[i] != 0:
                stats_i = _scale_stats(x[i], y[i])
                l += weights[i] * (
                    w_nnu * _loss_from_stats(stats_i, normal_weight[i], normal_weight[i])
                    + w_ada * _loss_from_stats(stats_i, w[i], w_1[i]))
        return l


if __name__ == "__main__":
    key = jax.random.PRNGKey(0)
    B, C = 2, 4
    scales = [(16, 16), (8, 8), (4, 4)]   # deep-supervision pyramid

    x_list, y_list = [], []
    for (H, W) in scales:
        key, k1, k2 = jax.random.split(key, 3)
        x_list.append(jax.random.normal(k1, (B, C, H, W), dtype=jnp.float32))
        y_list.append(jax.random.randint(k2, (B, 1, H, W), 0, C, dtype=jnp.int32))

    # per-scale, per-class adaptive weights (deterministic, positive)
    key, kw, kw1 = jax.random.split(key, 3)
    w_cls = jax.random.uniform(kw, (len(scales), C), dtype=jnp.float32) + 0.5
    w1_cls = jax.random.uniform(kw1, (len(scales), C), dtype=jnp.float32) + 0.5
    e, m = 5.0, 10.0   # current epoch < max epoch -> blended nnU-Net / adaptive loss

    loss_mod = MultipleOutputLoss2(weight_factors=None)
    out = loss_mod(x_list, y_list, w=(w_cls, w1_cls, e, m))
    out = jax.block_until_ready(out)
    assert out.shape == () and jnp.isfinite(out)
    print("KERNEL_OK")
</pallas_src>

<mosaic_0001>
module attributes {stable_mosaic.version = 11 : i64} {
  func.func @_stats_kernel(%arg0: i32, %arg1: i32, %arg2: memref<1x4x256xf32, #tpu.memory_space<vmem>>, %arg3: memref<1x1x256xi32, #tpu.memory_space<vmem>>, %arg4: memref<1x4x128xf32, #tpu.memory_space<vmem>>, %arg5: memref<4x128xf32, #tpu.memory_space<vmem>>) attributes {dimension_semantics = [#tpu.dimension_semantics<parallel>, #tpu.dimension_semantics<arbitrary>], iteration_bounds = array<i64: 2, 1>, scalar_prefetch = 0 : i64, scratch_operands = 1 : i64, tpu.core_type = #tpu.core_type<tc>, window_params = [{transform_indices = @transform_0, window_bounds = array<i64: 1, 4, 256>}, {transform_indices = @transform_1, window_bounds = array<i64: 1, 1, 256>}, {transform_indices = @transform_2, window_bounds = array<i64: 1, 4, 128>}]} {
    %c0_i32 = arith.constant 0 : i32
    %0 = arith.cmpi eq, %arg1, %c0_i32 : i32
    %1 = arith.extui %0 : i1 to i32
    %c0_i32_0 = arith.constant 0 : i32
    %2 = arith.cmpi ne, %1, %c0_i32_0 : i32
    scf.if %2 {
      %cst_21 = arith.constant 0.000000e+00 : f32
      %76 = vector.broadcast %cst_21 : f32 to vector<4x128xf32>
      %c0_22 = arith.constant 0 : index
      %c0_23 = arith.constant 0 : index
      %77 = vector.load %arg5[%c0_22, %c0_23] : memref<4x128xf32, #tpu.memory_space<vmem>>, vector<4x128xf32>
      tpu.vector_store %arg5[%c0_22, %c0_23], %76 {strides = array<i32>} : memref<4x128xf32, #tpu.memory_space<vmem>>, vector<4x128xf32>,
    } else {
    }
    %c0 = arith.constant 0 : index
    %c0_1 = arith.constant 0 : index
    %c0_2 = arith.constant 0 : index
    %3 = vector.load %arg2[%c0, %c0_1, %c0_2] : memref<1x4x256xf32, #tpu.memory_space<vmem>>, vector<1x4x256xf32>
    %4 = vector.shape_cast %3 : vector<1x4x256xf32> to vector<4x256xf32>
    %c0_3 = arith.constant 0 : index
    %c0_4 = arith.constant 0 : index
    %c0_5 = arith.constant 0 : index
    %5 = vector.load %arg3[%c0_3, %c0_4, %c0_5] : memref<1x1x256xi32, #tpu.memory_space<vmem>>, vector<1x1x256xi32>
    %6 = vector.shape_cast %5 : vector<1x1x256xi32> to vector<1x256xi32>
    %cst = arith.constant dense<0xFF800000> : vector<256xf32>
    %7 = vector.multi_reduction <maximumf>, %4, %cst [0] : vector<4x256xf32> to vector<256xf32>
    %8 = vector.shape_cast %7 : vector<256xf32> to vector<1x256xf32>
    %9 = vector.broadcast %8 : vector<1x256xf32> to vector<4x256xf32>
    %10 = arith.subf %4, %9 : vector<4x256xf32>
    %11 = math.exp %10 : vector<4x256xf32>
    %cst_6 = arith.constant dense<0.000000e+00> : vector<256xf32>
    %12 = vector.multi_reduction <add>, %11, %cst_6 [0] : vector<4x256xf32> to vector<256xf32>
    %13 = vector.shape_cast %12 : vector<256xf32> to vector<1x256xf32>
    %14 = tpu.reciprocal %13 {approx = true} : vector<1x256xf32> -> vector<1x256xf32>
    %15 = vector.broadcast %14 : vector<1x256xf32> to vector<4x256xf32>
    %16 = arith.mulf %11, %15 : vector<4x256xf32>
    %17 = vector.broadcast %8 : vector<1x256xf32> to vector<4x256xf32>
    %18 = arith.subf %4, %17 : vector<4x256xf32>
    %19 = math.log %13 : vector<1x256xf32>
    %20 = vector.broadcast %19 : vector<1x256xf32> to vector<4x256xf32>
    %21 = arith.subf %18, %20 : vector<4x256xf32>
    %22 = tpu.iota {dimensions = array<i32: 0>} : vector<4x256xi32>
    %23 = vector.broadcast %6 : vector<1x256xi32> to vector<4x256xi32>
    %24 = arith.cmpi eq, %22, %23 : vector<4x256xi32>
    %25 = arith.extui %24 : vector<4x256xi1> to vector<4x256xi32>
    %26 = arith.sitofp %25 : vector<4x256xi32> to vector<4x256xf32>
    %c0_i32_7 = arith.constant 0 : i32
    %27 = vector.broadcast %c0_i32_7 : i32 to vector<1x256xi32>
    %28 = arith.cmpi sge, %6, %27 : vector<1x256xi32>
    %29 = arith.extui %28 : vector<1x256xi1> to vector<1x256xi32>
    %30 = arith.sitofp %29 : vector<1x256xi32> to vector<1x256xf32>
    %31 = vector.broadcast %30 : vector<1x256xf32> to vector<4x256xf32>
    %32 = arith.mulf %16, %31 : vector<4x256xf32>
    %cst_8 = arith.constant 0.000000e+00 : f32
    %33 = vector.broadcast %cst_8 : f32 to vector<4x256xf32>
    %34 = arith.subf %33, %21 : vector<4x256xf32>
    %35 = arith.mulf %34, %26 : vector<4x256xf32>
    %cst_9 = arith.constant dense<0.000000e+00> : vector<4xf32>
    %36 = vector.multi_reduction <add>, %35, %cst_9 [1] : vector<4x256xf32> to vector<4xf32>
    %37 = vector.shape_cast %36 : vector<4xf32> to vector<4x1xf32>
    %cst_10 = arith.constant dense<0.000000e+00> : vector<4xf32>
    %38 = vector.multi_reduction <add>, %26, %cst_10 [1] : vector<4x256xf32> to vector<4xf32>
    %39 = vector.shape_cast %38 : vector<4xf32> to vector<4x1xf32>
    %40 = arith.mulf %32, %26 : vector<4x256xf32>
    %cst_11 = arith.constant dense<0.000000e+00> : vector<4xf32>
    %41 = vector.multi_reduction <add>, %40, %cst_11 [1] : vector<4x256xf32> to vector<4xf32>
    %42 = vector.shape_cast %41 : vector<4xf32> to vector<4x1xf32>
    %cst_12 = arith.constant dense<0.000000e+00> : vector<4xf32>
    %43 = vector.multi_reduction <add>, %32, %cst_12 [1] : vector<4x256xf32> to vector<4xf32>
    %44 = vector.shape_cast %43 : vector<4xf32> to vector<4x1xf32>
    %45 = tpu.iota {dimensions = array<i32: 1>} : vector<4x128xi32>
    %cst_13 = arith.constant 0.000000e+00 : f32
    %46 = vector.broadcast %cst_13 : f32 to vector<4x128xf32>
    %c0_14 = arith.constant 0 : index
    %c0_15 = arith.constant 0 : index
    %47 = vector.load %arg5[%c0_14, %c0_15] : memref<4x128xf32, #tpu.memory_space<vmem>>, vector<4x128xf32>
    %c0_i32_16 = arith.constant 0 : i32
    %48 = vector.broadcast %c0_i32_16 : i32 to vector<4x128xi32>
    %49 = arith.cmpi eq, %45, %48 : vector<4x128xi32>
    %50 = vector.shape_cast %37 : vector<4x1xf32> to vector<4x1xf32>
    %51 = vector.broadcast %50 : vector<4x1xf32> to vector<4x128xf32>
    %52 = arith.select %49, %51, %46 : vector<4x128xi1>, vector<4x128xf32>
    %c1_i32 = arith.constant 1 : i32
    %53 = vector.broadcast %c1_i32 : i32 to vector<4x128xi32>
    %54 = arith.cmpi eq, %45, %53 : vector<4x128xi32>
    %55 = vector.shape_cast %39 : vector<4x1xf32> to vector<4x1xf32>
    %56 = vector.broadcast %55 : vector<4x1xf32> to vector<4x128xf32>
    %57 = arith.select %54, %56, %46 : vector<4x128xi1>, vector<4x128xf32>
    %58 = arith.addf %52, %57 : vector<4x128xf32>
    %c2_i32 = arith.constant 2 : i32
    %59 = vector.broadcast %c2_i32 : i32 to vector<4x128xi32>
    %60 = arith.cmpi eq, %45, %59 : vector<4x128xi32>
    %61 = vector.shape_cast %42 : vector<4x1xf32> to vector<4x1xf32>
    %62 = vector.broadcast %61 : vector<4x1xf32> to vector<4x128xf32>
    %63 = arith.select %60, %62, %46 : vector<4x128xi1>, vector<4x128xf32>
    %64 = arith.addf %58, %63 : vector<4x128xf32>
    %c3_i32 = arith.constant 3 : i32
    %65 = vector.broadcast %c3_i32 : i32 to vector<4x128xi32>
    %66 = arith.cmpi eq, %45, %65 : vector<4x128xi32>
    %67 = vector.shape_cast %44 : vector<4x1xf32> to vector<4x1xf32>
    %68 = vector.broadcast %67 : vector<4x1xf32> to vector<4x128xf32>
    %69 = arith.select %66, %68, %46 : vector<4x128xi1>, vector<4x128xf32>
    %70 = arith.addf %64, %69 : vector<4x128xf32>
    %71 = arith.addf %47, %70 : vector<4x128xf32>
    %c0_17 = arith.constant 0 : index
    %c0_18 = arith.constant 0 : index
    %72 = vector.load %arg5[%c0_17, %c0_18] : memref<4x128xf32, #tpu.memory_space<vmem>>, vector<4x128xf32>
    tpu.vector_store %arg5[%c0_17, %c0_18], %71 {strides = array<i32>} : memref<4x128xf32, #tpu.memory_space<vmem>>, vector<4x128xf32>,
    %c0_i32_19 = arith.constant 0 : i32
    %73 = arith.cmpi eq, %arg1, %c0_i32_19 : i32
    %74 = arith.extui %73 : i1 to i32
    %c0_i32_20 = arith.constant 0 : i32
    %75 = arith.cmpi ne, %74, %c0_i32_20 : i32
    scf.if %75 {
      %c0_21 = arith.constant 0 : index
      %c0_22 = arith.constant 0 : index
      %76 = vector.load %arg5[%c0_21, %c0_22] : memref<4x128xf32, #tpu.memory_space<vmem>>, vector<4x128xf32>
      %c0_23 = arith.constant 0 : index
      %c0_24 = arith.constant 0 : index
      %c0_25 = arith.constant 0 : index
      %77 = vector.load %arg4[%c0_23, %c0_24, %c0_25] : memref<1x4x128xf32, #tpu.memory_space<vmem>>, vector<1x4x128xf32>
      %78 = vector.shape_cast %77 : vector<1x4x128xf32> to vector<4x128xf32>
      %79 = vector.shape_cast %76 : vector<4x128xf32> to vector<1x4x128xf32>
      tpu.vector_store %arg4[%c0_23, %c0_24, %c0_25], %79 {strides = array<i32>} : memref<1x4x128xf32, #tpu.memory_space<vmem>>, vector<1x4x128xf32>,
    } else {
    }
    return
  }
  func.func @transform_0(%arg0: i32, %arg1: i32) -> (i32, i32, i32) {
    %c0_i32 = arith.constant 0 : i32
    %c0_i32_0 = arith.constant 0 : i32
    return %arg0, %c0_i32, %arg1 : i32, i32, i32
  }
  func.func @transform_1(%arg0: i32, %arg1: i32) -> (i32, i32, i32) {
    %c0_i32 = arith.constant 0 : i32
    %c0_i32_0 = arith.constant 0 : i32
    return %arg0, %c0_i32, %arg1 : i32, i32, i32
  }
  func.func @transform_2(%arg0: i32, %arg1: i32) -> (i32, i32, i32) {
    %c0_i32 = arith.constant 0 : i32
    %c0_i32_0 = arith.constant 0 : i32
    %c0_i32_1 = arith.constant 0 : i32
    return %arg0, %c0_i32, %c0_i32_0 : i32, i32, i32
  }
}

</mosaic_0001>

<bundles_post_ra>
// kernel: tpu_custom_call.1
= control target key start
LH: loop header
LB: loop body
LE: loop exit
PB: predicated region body
PF: predicated region fallthrough
CT: control target
= control target key end

     0   :  { %7 = vsyncpa [#allocation4], 0  ;;  %s998_s0 = inlined_call_operand.hbm [shape: f32[2,4,256], index: 0, kind: input, shape index: {}]   ;;  %s999_s1 = inlined_call_operand.hbm [shape: s32[2,1,256], index: 1, kind: input, shape index: {}]   ;;  %s1000_s2 = inlined_call_operand.hbm [shape: f32[2,4,128], index: 2, kind: output, shape index: {}]  }
   0x1   :  { %9 = vsyncpa [#allocation4 + $0x1], 0 }
   0x2   :  { %10 = vsyncpa [#allocation7], 0 }
   0x3   :  { %12 = vsyncpa [#allocation7 + $0x1], 0 }
   0x4   :  { %13 = vsyncpa [#allocation5], 0 }
   0x5   :  { %15 = vsyncpa [#allocation5 + $0x1], 0  ;;  %s763_s9 = smov 0   ;;  %s765_s10 = smov 0  }
   0x6   :  { %s767_s11 = smov 0   ;;  %s769_s12 = smov 0  }
   0x7   :  { %s771_s13 = smov 0   ;;  %s773_s14 = smov 0  }
   0x8 LB: > { %s494_s15 = sadd.s32 4294967295, %s742_s14   ;;  %s495_s16 = sadd.s32 4294967294, %s742_s14   ;;  %s742_s14 = sphi %s773_s14, %s21_s14   ;;  %s738_s13 = sphi %s771_s13, %s1020_s13   ;;  %s734_s12 = sphi %s769_s12, %s1019_s12   ;;  %s730_s11 = sphi %s767_s11, %s1018_s11   ;;  %s726_s10 = sphi %s765_s10, %s1017_s10   ;;  %s722_s9 = sphi %s763_s9, %s1016_s9  }
   0x9   : > { %s33_s17 = sadd.s32 1, %s738_s13  ;;  %s42_s18 = sadd.s32 1, %s730_s11 }
   0xa   : > { %p35_p0 = scmp.ge.s32.totalorder %s33_s17, 2  ;;  %p49_p1 = scmp.ne.s32.totalorder %s730_s11, %s726_s10 }
   0xb   : > { %p50_p2 = scmp.eq.s32.totalorder %s742_s14, 0  ;;  %p55_p3 = scmp.ne.s32.totalorder %s726_s10, %s722_s9 }
   0xc   : > { %s1022_s17 = smov (%p35_p0, %s33_s17), 0  ;;  %p56_p5 = scmp.eq.s32.totalorder %s494_s15, 0 }
   0xd   : > { %p804_p4 = por %p50_p2, %p49_p1  ;;  %s37_s20 = ssub.s32 %s738_s13, %s1022_s17 }
   0xe   : > { %p107_p6 = scmp.eq.s32.totalorder %s494_s15, 1  ;;  %p40_p7 = scmp.eq.s32.totalorder %s37_s20, 0 }
   0xf   : > { %p810_p8 = por %p56_p5, %p55_p3  ;;  %p113_p10 = scmp.eq.s32.totalorder %s495_s16, 1 }
  0x10   : > { %p814_p9 = por %p107_p6, %p49_p1  ;;  %p534_p13 = scmp.lt.s32.totalorder %s742_s14, 2 }
  0x11   : > { %s1004_s21 = scalar_select %p810_p8, 1, 0 }
  0x12   : > { %s1005_s22 = scalar_select %p814_p9, 1, 0 }
  0x13   : > { %s819_s23 = scalar_select %p40_p7, %s730_s11, %s42_s18  }
  0x14   : > { %p821_p11 = por %p113_p10, %p55_p3  ;;  %s828_s25 = sand.u32 1, %s730_s11  }
  0x15   : > { %s498_s26 = sshll.u32 %s828_s25, 3  ;;  %s515_s27 = sshll.u32 %s738_s13, 7 }
  0x16   : > { %s1006_s24 = scalar_select %p821_p11, 1, 0 }
  0x17   : > { %s835_s30 = scalar_lea.hbm %s998_s0, %s515_s27  ;;  %s137_s3 = scalar_lea.vmem [#allocation3], %s498_s26 }
  0x18   : > { %s147_s4 = sshll.u32 %s137_s3, 4  ;;  %p841_p0 = pnand %p534_p13, %p804_p4  ;;  %s837_s4 = int_to_ptr.vmem [resolvable:$true] %s147_s4 }
  0x19   : > { %s134_s6 = scalar_lea.sflag [#allocation4], %s828_s25  ;;  %s596_s7 = scalar_lea.hbm %s835_s30, 128 }
  0x1a   : > { %p597_p3 = scmp.ne.s32.totalorder %s835_s30, %s596_s7  ;;  %p598_p5 = pneg %p841_p0 }
  0x1b   : > { %s601_s16 = scalar_lea.hbm %s998_s0, 256  ;;  %p602_p4 = scmp.lt.u32.totalorder %s835_s30, %s998_s0 }
  0x1c   : > { %p599_p6 = pnand %p598_p5, %p597_p3  ;;  %p603_p10 = scmp.lt.u32.totalorder %s601_s16, %s596_s7 }
  0x1d   : > { %p605_p12 = scmp.lt.u32.totalorder %s596_s7, %s835_s30 }
  0x1e   : > { %p600_p7 = pneg %p599_p6  ;;  %p604_p13 = por %p603_p10, %p602_p4 }
  0x20   : > { %p606_p1 = por %p605_p12, %p604_p13 }
  0x22   : > { %p607_p2 = pnand %p606_p1, %p600_p7 }
  0x24   : > { %610 = shalt.err (!%p607_p2)
}
  0x25   : > { %s611_s20 = scalar_lea.vmem %s837_s4, 128  ;;  %s744_s26 = smov [#allocation3]  }
  0x26   : > { %p612_p3 = scmp.ne.s32.totalorder %s837_s4, %s611_s20  ;;  %s616_s27 = sshll.u32 %s744_s26, 4  ;;  %s617_s27 = int_to_ptr.vmem [resolvable:$false] %s616_s27 }
  0x27   : > { %s618_s28 = scalar_lea.vmem %s617_s27, 256  ;;  %p619_p9 = scmp.lt.s32.totalorder %s837_s4, %s617_s27 }
  0x28   : > { %p614_p6 = pnand %p612_p3, %p598_p5  ;;  %p620_p4 = scmp.lt.s32.totalorder %s618_s28, %s611_s20 }
  0x2a   : > { %p615_p11 = pneg %p614_p6  ;;  %p621_p10 = por %p620_p4, %p619_p9 }
  0x2c   : > { %p622_p12 = pnand %p621_p10, %p615_p11 }
  0x2e   : > { %625 = shalt.err (!%p622_p12)
}
  0x2f   : > { %526 = dma.hbm_to_vmem [thread:$0]  (!%p841_p0), %s835_s30, 128, %s837_s4, %s134_s6  }
  0x30   : > { %p1008_p1 = scmp.lt.s32.totalorder %s742_s14, 3  ;;  %p1009_p2 = scmp.ge.s32.totalorder %s742_s14, 1 }
  0x31   : > { %s501_s3 = sshll.u32 %s828_s25, 1  ;;  %s516_s7 = sshll.u32 %s738_s13, 5 }
  0x32   : > { %p877_p7 = pnand %p1009_p2, %p1008_p1  ;;  %s886_s16 = scalar_lea.hbm %s999_s1, %s516_s7 }
  0x33   : > { %s158_s18 = scalar_lea.vmem [#allocation6], %s501_s3  ;;  %s155_s30 = scalar_lea.sflag [#allocation7], %s828_s25 }
  0x34   : > { %s1010_s29 = scalar_select %p877_p7, 1, 0 }
  0x35   : > { %s168_s19 = sshll.u32 %s158_s18, 4  ;;  %s626_s4 = scalar_lea.hbm %s886_s16, 32  ;;  %s169_s19 = int_to_ptr.vmem [resolvable:$true] %s168_s19 }
  0x36   : > { %p627_p9 = scmp.ne.s32.totalorder %s886_s16, %s626_s4  ;;  %s631_s26 = scalar_lea.hbm %s999_s1, 64 }
  0x37   : > { %p632_p3 = scmp.lt.u32.totalorder %s886_s16, %s999_s1  ;;  %p633_p6 = scmp.lt.u32.totalorder %s631_s26, %s626_s4 }
  0x38   : > { %p629_p11 = pnand %p627_p9, %p598_p5  ;;  %p635_p10 = scmp.lt.u32.totalorder %s626_s4, %s886_s16 }
  0x39   : > { %p634_p4 = por %p633_p6, %p632_p3 }
  0x3a   : > { %p630_p13 = pneg %p629_p11 }
  0x3b   : > { %p636_p12 = por %p635_p10, %p634_p4 }
  0x3d   : > { %p637_p1 = pnand %p636_p12, %p630_p13 }
  0x3f   : > { %640 = shalt.err (!%p637_p1)
}
  0x40   : > { %s641_s25 = scalar_lea.vmem %s169_s19, 32  ;;  %s745_s3 = smov [#allocation6]  }
  0x41   : > { %p642_p2 = scmp.ne.s32.totalorder %s169_s19, %s641_s25  ;;  %s646_s7 = sshll.u32 %s745_s3, 4  ;;  %s647_s7 = int_to_ptr.vmem [resolvable:$false] %s646_s7 }
  0x42   : > { %s648_s8 = scalar_lea.vmem %s647_s7, 64  ;;  %p649_p8 = scmp.lt.s32.totalorder %s169_s19, %s647_s7 }
  0x43   : > { %p644_p9 = pnand %p642_p2, %p598_p5  ;;  %p650_p7 = scmp.lt.s32.totalorder %s648_s8, %s641_s25 }
  0x45   : > { %p645_p11 = pneg %p644_p9  ;;  %p651_p3 = por %p650_p7, %p649_p8 }
  0x47   : > { %p652_p6 = pnand %p651_p3, %p645_p11 }
  0x49   : > { %655 = shalt.err (!%p652_p6)
}
  0x4a   : > { %529 = dma.hbm_to_vmem [thread:$0]  (!%p841_p0), %s886_s16, 32, %s169_s19, %s155_s30  }
  0x4b   : > { %p1011_p13 = scmp.ne.s32.totalorder %s1010_s29, 0 }
  0x4c   : > { %s911_s15 = sand.u32 (!%p1011_p13), 1, %s726_s10   ;;  %p1012_p5 = scmp.ne.s32.totalorder (!%p1011_p13), %s1004_s21, 0 }
  0x4d   : > { %177 = sbr.rel (%p1011_p13) target bundleno = 339 (0x153), region = 28  ;;  %s505_s18 = sshll.u32 (!%p1011_p13), %s911_s15, 3 }
  0x4e   : > { %s180_s4 = scalar_lea.sflag (!%p1011_p13), [#allocation4], %s911_s15  ;;  %s183_s6 = scalar_lea.vmem (!%p1011_p13), [#allocation3], %s505_s18 }
  0x54   : > { %709 = dma.done.wait (%p1012_p5), %s180_s4, 128  }
  0x55   : > { %711 = vsyncadd (%p1012_p5), %s180_s4, 4294967168  ;;  %s506_s5 = sshll.u32 %s911_s15, 1  ;;  %s189_s29 = scalar_lea.sflag [#allocation7], %s911_s15 }
  0x56   : > { %s921_s16 = scalar_lea.vmem [#allocation6], %s506_s5 }
  0x57   : > { %713 = dma.done.wait (%p1012_p5), %s189_s29, 32  }
  0x58   : > { %715 = vsyncadd (%p1012_p5), %s189_s29, 4294967264  ;;  %v746_v0 = vmov 0.0   ;;  %vm230_vm0 = vcmask 1043456   ;;  %v225_v1 = vld [vmem:[%s183_s6] sm:$0xff]  ;;  %v285_v31 = vlaneseq  ;;  %v226_v38 = vld [vmem:[%s921_s16] sm:$0x3] }
  0x59   : > { %224 = vst [vmem:[#allocation2] sm:$0xf] %v746_v0  ;;  %v228_v2 = vcombine.high %v225_v1, %v225_v1  ;;  %v231_v3 = vsel %vm230_vm0, %v225_v1, -inf  ;;  %vm301_vm1 = vcmp.ge.s32.totalorder %v226_v38, 0  ;;  %s507_s21 = sshll.u32 %s911_s15, 2  ;;  %s512_s19 = sshll.u32 %s734_s12, 6 }
  0x5a   : > { %v232_v4 = vrot.slane %v231_v3, 4  ;;  %v286_v36 = vshrl.u32 %v285_v31, 7  ;;  %v510_v43 = vsel %vm301_vm1, 1.0, %v746_v0  ;;  %s217_s30 = scalar_lea.vmem [#allocation8], %s507_s21  ;;  %s949_s28 = scalar_lea.hbm %s1000_s2, %s512_s19 }
  0x5b   : > { %v238_v5 = vsel %vm230_vm0, %v228_v2, -inf  ;;  %s387_s20 = sshll.u32 %s217_s30, 4  ;;  %s374_s25 = scalar_lea.sflag [#allocation5], %s911_s15  ;;  %s951_s20 = int_to_ptr.vmem [resolvable:$true] %s387_s20 }
  0x5c   : > { %v233_v6 = vmax.f32 %v231_v3, %v232_v4  ;;  %v239_v7 = vrot.slane %v238_v5, 4  ;;  %v289_v39 = vsub.s32 0, %v286_v36  ;;  %v293_v40 = vsub.s32 1, %v286_v36  ;;  %s656_s3 = scalar_lea.vmem %s951_s20, 64  ;;  %p1013_p0 = scmp.ne.s32.totalorder %s1005_s22, 0 }
  0x5d   : > { %p657_p8 = scmp.ne.s32.totalorder %s951_s20, %s656_s3  ;;  %s747_s12 = smov [#allocation8]  }
  0x5e   : > { %v234_v8 = vrot.slane %v233_v6, 2  ;;  %v240_v9 = vmax.f32 %v238_v5, %v239_v7  ;;  %v290_v41 = vrot.slane %v226_v38, %v289_v39  ;;  %v294_v42 = vrot.slane %v226_v38, %v293_v40  ;;  %s660_s7 = sshll.u32 %s747_s12, 4  ;;  %s661_s7 = int_to_ptr.vmem [resolvable:$false] %s660_s7 }
  0x5f   : > { %v308_v45 = vrot.slane %v510_v43, %v289_v39  ;;  %v312_v46 = vrot.slane %v510_v43, %v293_v40  ;;  %p658_p7 = pnand %p657_p8, %p1013_p0  ;;  %s662_s8 = scalar_lea.vmem %s661_s7, 128 }
  0x60   : > { %v235_v10 = vmax.f32 %v233_v6, %v234_v8  ;;  %v241_v11 = vrot.slane %v240_v9, 2  ;;  %vm295_vm2 = vcmp.eq.s32.totalorder %v286_v36, %v290_v41  ;;  %vm296_vm3 = vcmp.eq.s32.totalorder %v286_v36, %v294_v42  ;;  %p663_p10 = scmp.lt.s32.totalorder %s951_s20, %s661_s7  ;;  %p664_p12 = scmp.lt.s32.totalorder %s662_s8, %s656_s3 }
  0x61   : > { %v508_v52 = vsel %vm295_vm2, 1.0, %v746_v0  ;;  %v509_v53 = vsel %vm296_vm3, 1.0, %v746_v0  ;;  %v313_v55 = vcombine.low %v308_v45, %v312_v46  ;;  %p659_p4 = pneg %p658_p7 }
  0x62   : > { %v236_v12 = vrot.slane %v235_v10, 1  ;;  %v242_v13 = vmax.f32 %v240_v9, %v241_v11  ;;  %v319_v59 = vcombine.low %v508_v52, %v509_v53  ;;  %v330_v9 = vsel %vm230_vm0, %v508_v52, 0.0  ;;  %p665_p1 = por %p664_p12, %p663_p10 }
  0x64   : > { %v237_v14 = vmax.f32 %v235_v10, %v236_v12  ;;  %v243_v15 = vrot.slane %v242_v13, 1  ;;  %v331_v10 = vsel %vm230_vm0, %v509_v53, 0.0  ;;  %p666_p2 = pnand %p665_p1, %p659_p4 }
  0x66   : > { %v244_v16 = vmax.f32 %v242_v13, %v243_v15  ;;  %v353_v15 = vand.u32 127, %v285_v31 }
  0x68   : > { %v247_v17 = vcombine.low %v237_v14, %v244_v16  ;;  %v332_v14 = vadd.f32 %v331_v10, %v330_v9  ;;  %vm355_vm4 = vcmp.eq.s32.totalorder %v353_v15, 0  ;;  %vm357_vm5 = vcmp.eq.s32.totalorder %v353_v15, 1 }
  0x69   : > { %vm360_vm6 = vcmp.eq.s32.totalorder %v353_v15, 2  ;;  %vm363_vm7 = vcmp.eq.s32.totalorder %v353_v15, 3 }
  0x6a   : > { %v249_v18 = vsub.f32 %v225_v1, %v247_v17 }
  0x6c   : > { %v250_v19 = vmul.f32 1.442695, %v249_v18 }
  0x6e   : > { %586 = vpow2.f32 %v250_v19 }
  0x78   : > { %v587_v20 = vpop.eup %586 }
  0x79   : > { %v253_v21 = vcombine.high %v587_v20, %v587_v20  ;;  %v255_v22 = vsel %vm230_vm0, %v587_v20, 0.0 }
  0x7a   : > { %v256_v23 = vrot.slane %v255_v22, 4 }
  0x7b   : > { %v262_v24 = vsel %vm230_vm0, %v253_v21, 0.0 }
  0x7c   : > { %v257_v25 = vadd.f32 %v256_v23, %v255_v22  ;;  %v263_v26 = vrot.slane %v262_v24, 4 }
  0x7e   : > { %v258_v27 = vrot.slane %v257_v25, 2  ;;  %v264_v28 = vadd.f32 %v263_v26, %v262_v24  ;;  %v354_v26 = vld [vmem:[#allocation2] sm:$0xf] }
  0x80   : > { %v259_v29 = vadd.f32 %v258_v27, %v257_v25  ;;  %v265_v30 = vrot.slane %v264_v28, 2 }
  0x82   : > { %v260_v32 = vrot.slane %v259_v29, 1  ;;  %v266_v33 = vadd.f32 %v265_v30, %v264_v28 }
  0x84   : > { %v261_v34 = vadd.f32 %v260_v32, %v259_v29  ;;  %v267_v35 = vrot.slane %v266_v33, 1 }
  0x86   : > { %v268_v37 = vadd.f32 %v267_v35, %v266_v33  ;;  %588 = vrcp.f32 %v261_v34 }
  0x87   : > { %590 = vlog2.f32 %v261_v34 }
  0x88   : > { %592 = vlog2.f32 %v268_v37 }
  0x89   : > { %594 = vrcp.f32 %v268_v37 }
  0x90   : > { %v589_v44 = vpop.eup %588 }
  0x91   : > { %v591_v47 = vpop.eup %590 }
  0x92   : > { %v593_v48 = vpop.eup %592  ;;  %v277_v49 = vmul.f32 0.6931472, %v591_v47 }
  0x93   : > { %v595_v50 = vpop.eup %594  ;;  %v279_v51 = vmul.f32 0.6931472, %v593_v48 }
  0x94   : > { %v273_v54 = vcombine.low %v589_v44, %v595_v50 }
  0x95   : > { %v282_v56 = vcombine.low %v277_v49, %v279_v51 }
  0x96   : > { %v275_v57 = vmul.f32 %v587_v20, %v273_v54 }
  0x97   : > { %v284_v58 = vsub.f32 %v249_v18, %v282_v56 }
  0x98   : > { %v315_v60 = vmul.f32 %v313_v55, %v275_v57 }
  0x99   : > { %v316_v61 = vsub.f32 0.0, %v284_v58 }
  0x9a   : > { %v335_v62 = vmul.f32 %v319_v59, %v315_v60  ;;  %v345_v63 = vcombine.high %v315_v60, %v315_v60  ;;  %v347_v0 = vsel %vm230_vm0, %v315_v60, 0.0 }
  0x9b   : > { %v321_v1 = vmul.f32 %v319_v59, %v316_v61 }
  0x9c   : > { %v337_v2 = vcombine.high %v335_v62, %v335_v62  ;;  %v339_v3 = vsel %vm230_vm0, %v335_v62, 0.0  ;;  %v348_v7 = vsel %vm230_vm0, %v345_v63, 0.0 }
  0x9d   : > { %v323_v4 = vcombine.high %v321_v1, %v321_v1  ;;  %v325_v5 = vsel %vm230_vm0, %v321_v1, 0.0  ;;  %v349_v13 = vadd.f32 %v348_v7, %v347_v0 }
  0x9e   : > { %v340_v6 = vsel %vm230_vm0, %v337_v2, 0.0 }
  0x9f   : > { %v326_v8 = vsel %vm230_vm0, %v323_v4, 0.0  ;;  %v341_v11 = vadd.f32 %v340_v6, %v339_v3 }
  0xa0   : > { %v327_v12 = vadd.f32 %v326_v8, %v325_v5 }
  0xa1   : > { %342 = vadd.xlane.f32.xlu1 %v341_v11 }
  0xa2   : > { %328 = vadd.xlane.f32.xlu0 %v327_v12 }
  0xa5   : > { %350 = vadd.xlane.f32.xlu1 %v349_v13 }
  0xa6   : > { %333 = vadd.xlane.f32.xlu0 %v332_v14 }
 0x12e   : > { %v343_v16 = vpop.xlane.xlu1 %342 }
 0x12f   : > { %v329_v17 = vpop.xlane.xlu0 %328  ;;  %v361_v23 = vsel %vm360_vm6, %v343_v16, 0.0 }
 0x130   : > { %v356_v20 = vsel %vm355_vm4, %v329_v17, 0.0 }
 0x132   : > { %v351_v19 = vpop.xlane.xlu1 %350 }
 0x133   : > { %v334_v18 = vpop.xlane.xlu0 %333  ;;  %v364_v24 = vsel %vm363_vm7, %v351_v19, 0.0 }
 0x134   : > { %v358_v21 = vsel %vm357_vm5, %v334_v18, 0.0 }
 0x135   : > { %v359_v22 = vadd.f32 %v358_v21, %v356_v20 }
 0x137   : > { %v362_v25 = vadd.f32 %v361_v23, %v359_v22 }
 0x139   : > { %v365_v27 = vadd.f32 %v364_v24, %v362_v25 }
 0x13b   : > { %v366_v28 = vadd.f32 %v365_v27, %v354_v26 }
 0x13d   : > { %367 = vst [vmem:[#allocation2] sm:$0xf] %v366_v28 }
 0x144   : > { %v371_v29 = vld [vmem:[#allocation2] sm:$0xf] }
 0x145   : > { %372 = vst [vmem:[%s217_s30] sm:$0xf] %v371_v29 }
 0x146   : > { %669 = shalt.err (!%p666_p2)
}
 0x147   : > { %s670_s15 = scalar_lea.hbm %s949_s28, 64  ;;  %s674_s6 = scalar_lea.hbm %s1000_s2, 128 }
 0x148   : > { %p671_p9 = scmp.ne.s32.totalorder %s949_s28, %s670_s15  ;;  %p675_p6 = scmp.lt.u32.totalorder %s949_s28, %s1000_s2 }
 0x149   : > { %p676_p13 = scmp.lt.u32.totalorder %s674_s6, %s670_s15  ;;  %p678_p8 = scmp.lt.u32.totalorder %s670_s15, %s949_s28 }
 0x14a   : > { %p672_p11 = pnand %p671_p9, %p1013_p0 }
 0x14b   : > { %p677_p5 = por %p676_p13, %p675_p6 }
 0x14c   : > { %p673_p3 = pneg %p672_p11 }
 0x14d   : > { %p679_p7 = por %p678_p8, %p677_p5 }
 0x14f   : > { %p680_p4 = pnand %p679_p7, %p673_p3 }
 0x151   : > { %683 = shalt.err (!%p680_p4)
}
 0x152   : > { %521 = dma.vmem_to_hbm [thread:$0]  (%p1013_p0), %s951_s20, 64, %s949_s28, %s374_s25  }
 0x153 PF: > { %s399_s16 = sand.u32 1, %s722_s9   ;;  %p1014_p10 = scmp.ne.s32.totalorder %s1006_s24, 0 }
 0x154   : > { %p1015_p12 = scmp.ge.s32.totalorder %s742_s14, 2  ;;  %s400_s21 = scalar_lea.sflag [#allocation5], %s399_s16 }
 0x156   : > { %p531_p1 = pnand %p1015_p12, %p1014_p10 }
 0x158   : > { %717 = dma.done.wait (!%p531_p1), %s400_s21, 64  }
 0x159   : > { %719 = vsyncadd (!%p531_p1), %s400_s21, 4294967232  ;;  %s21_s14 = sadd.s32 1, %s742_s14   ;;  %s1016_s9 = smov %s726_s10 }
 0x15a   : > { %p18_p2 = scmp.ge.s32.totalorder %s21_s14, 4   ;;  %s1017_s10 = smov %s730_s11 }
 0x15b   : > { %s1018_s11 = smov %s819_s23  ;;  %s1019_s12 = smov %s738_s13 }
 0x15c   : > { %s1020_s13 = smov %s1022_s17  ;;  %20 = sbr.rel (!%p18_p2) target bundleno = 8 (0x8), region = 94 }
 0x163   :  { %405 = vsyncpa [#allocation4], 1 }
 0x164   :  { %407 = vsyncpa [#allocation4 + $0x1], 1 }
 0x165   :  { %408 = vsyncpa [#allocation7], 1 }
 0x166   :  { %410 = vsyncpa [#allocation7 + $0x1], 1 }
 0x167   :  { %411 = vsyncpa [#allocation5], 1 }
 0x168   :  { %413 = vsyncpa [#allocation5 + $0x1], 1 }

</bundles_post_ra>
